<compile_context>
chip_gen: v5e
topology: v5e:2x2
jax: 0.10.0
libtpu: 0.0.40
codegen_flags: <defaults>
</compile_context>

<pallas_src>
import jax
import jax.numpy as jnp
from jax.experimental import pallas as pl
from jax.experimental.pallas import tpu as pltpu

# ---- concrete instantiation of the wrapped model ---------------------------
B, C_IN, H, W = 2, 4, 16, 16
HW = H * W                       # 256 -> lane dimension (2 x 128)
C_OUT = 8
NUM_CLASSES = 10
KH = KW = 3                      # 3x3 conv, stride 1, padding 1
KTAPS = KH * KW                  # 9
BC_IN = B * C_IN                 # 8  -> sublane dim of the input view
BC_OUT = B * C_OUT               # 16 -> sublane dim of the conv output
KDIM = KTAPS * BC_IN             # 72 -> contraction dim of the single conv matmul
NC_PAD = 128                     # lane-dense logits width (sliced to 10 in wrapper)

assert W & (W - 1) == 0, "edge-mask trick assumes W is a power of two"

# Whole (tiny) arrays live in VMEM; total working set is well under 1 MiB.
_VMEM = pl.BlockSpec(memory_space=pltpu.MemorySpace.VMEM)


# ----------------------------- fused Pallas kernels -------------------------

def _conv_relu_gap(x_ref, convmat_ref, convb_ref):
    """Conv(3x3, pad=1) + bias + ReLU + global average pool, spatial on lanes.

    x_ref      : (B*C_IN, H*W)        flattened NCHW input (no transpose)
    convmat_ref: (B*C_OUT, 9*B*C_IN)  batch-block conv matrix (built once)
    convb_ref  : (B*C_OUT, 1)         conv bias, tiled per batch
    returns    : (B, C_OUT, 1) f32 pooled features (natural keepdims layout)
    """
    x = x_ref[...]                                            # (8, 256) = 2 vregs

    # Output-pixel coordinates along the lane axis; used to mask the edge taps
    # (replaces the old padded-image scratch + halo zero-fill).
    lane = jax.lax.broadcasted_iota(jnp.int32, (BC_IN, HW), 1)
    w_idx = jnp.bitwise_and(lane, W - 1)                      # w = lane % W

    # One shifted+masked copy of x per tap (roll = XLU lane rotate, mask = VPU
    # select).  Stacking the taps along sublanes gives the (72, 256) im2col
    # matrix with spatial kept lane-dense.
    cols = []
    for dy in range(KH):
        ho = dy - 1
        for dx in range(KW):
            wo = dx - 1
            delta = ho * W + wo                               # flat source offset
            if delta == 0:
                shifted = x
            else:
                # shifted[i] = x[i + delta]  (wrapped values are masked below)
                shifted = pltpu.roll(x, shift=(-delta) % HW, axis=1)
            conds = []
            if ho < 0:
                conds.append(lane >= W)                       # h - 1 >= 0
            if ho > 0:
                conds.append(lane < (H - 1) * W)              # h + 1 <  H
            if wo < 0:
                conds.append(w_idx >= 1)                      # w - 1 >= 0
            if wo > 0:
                conds.append(w_idx < W - 1)                   # w + 1 <  W
            if conds:
                valid = conds[0]
                for c in conds[1:]:
                    valid = jnp.logical_and(valid, c)
                shifted = jnp.where(valid, shifted, 0.0)
            cols.append(shifted)
    s_mat = jnp.concatenate(cols, axis=0)                     # (72, 256)

    # Single MXU matmul replaces the old 9 tiny per-tap matmuls: N = 256 is
    # fully lane-dense and the accumulator is (16, 256) f32 = 4 vregs.
    y = jnp.dot(convmat_ref[...], s_mat,
                preferred_element_type=jnp.float32)           # (16, 256)
    y = jnp.maximum(y + convb_ref[...], 0.0)                  # bias + ReLU fused

    # AdaptiveAvgPool2d(1) + Flatten: cross-lane reduce; keepdims keeps the
    # natural (B, C_OUT, 1) layout so the FC broadcast below needs no relayout.
    feats = jnp.sum(y.reshape(B, C_OUT, HW), axis=-1, keepdims=True) * (1.0 / HW)
    return feats                                              # (B, C_OUT, 1)


def _forward_kernel(x_ref, convmat_ref, convb_ref, fcw_ref, fcb_ref,
                    logits_ref, feats_ref):
    feats = _conv_relu_gap(x_ref, convmat_ref, convb_ref)     # (B, C_OUT, 1)
    feats_ref[...] = feats                                    # 2nd output: features
    # Final Linear on the VPU: a 2-row LHS is not worth an MXU fill/drain.
    # fc weights are pre-padded to 128 lanes -> lane-dense (unmasked) store.
    prod = feats * fcw_ref[...]                               # (B, C_OUT, 128)
    logits_ref[...] = jnp.sum(prod, axis=1) + fcb_ref[...]    # (B, 128)


def _compress_kernel(x_ref, convmat_ref, convb_ref, feats_ref):
    feats_ref[...] = _conv_relu_gap(x_ref, convmat_ref, convb_ref)


# ------------------------------ wrapper class -------------------------------

class CompressionWrapper:
    """JAX/Pallas port of the PyTorch CompressionWrapper around the small CNN."""

    def __init__(self, params):
        f32 = jnp.float32
        conv_w = params["conv_w"].astype(f32)                 # (3,3,4,8) HWIO
        conv_b = params["conv_b"].astype(f32)                 # (8,)
        fc_w = params["fc_w"].astype(f32)                     # (8,10)
        fc_b = params["fc_b"].astype(f32)                     # (10,)

        # Batch-block conv matrix A, shape (B*C_OUT, 9*B*C_IN):
        #   A[b*C_OUT+co, tap*B*C_IN + b*C_IN + ci] = conv_w[dy,dx,ci,co]
        # (zero across batches), so the whole conv is ONE matmul A @ S where S
        # stacks the 9 shifted images along the contraction dim.
        wt = conv_w.reshape(KTAPS, C_IN, C_OUT)               # (9,4,8)  [t,i,o]
        eye_b = jnp.eye(B, dtype=f32)                         # (2,2)    [x,y]
        self._conv_mat = jnp.einsum("xy,tio->xotyi", eye_b, wt).reshape(BC_OUT, KDIM)
        self._conv_b_col = jnp.tile(conv_b, (B,)).reshape(BC_OUT, 1)   # (16,1)

        # fc weights padded to a lane-dense 128-wide logits output.
        self._fc_w_pad = jnp.zeros((C_OUT, NC_PAD), f32).at[:, :NUM_CLASSES].set(fc_w)
        self._fc_b_pad = jnp.zeros((1, NC_PAD), f32).at[:, :NUM_CLASSES].set(fc_b)

        self._fused_jit = jax.jit(self._fused_impl)
        self._compress_jit = jax.jit(self._compress_impl)

    # ---- forward: full model in ONE fused, grid-less pallas_call -----------
    def _fused_impl(self, x_nchw):
        x2d = x_nchw.reshape(BC_IN, HW)                       # zero-cost NCHW view
        logits_pad, feats = pl.pallas_call(
            _forward_kernel,
            out_shape=(jax.ShapeDtypeStruct((B, NC_PAD), jnp.float32),
                       jax.ShapeDtypeStruct((B, C_OUT, 1), jnp.float32)),
            in_specs=[_VMEM] * 5,
            out_specs=(_VMEM, _VMEM),
        )(x2d, self._conv_mat, self._conv_b_col, self._fc_w_pad, self._fc_b_pad)
        return logits_pad[:, :NUM_CLASSES], feats.reshape(B, C_OUT)

    # ---- compress: all children except the final Linear, ONE fused call ----
    def _compress_impl(self, x_nchw):
        x2d = x_nchw.reshape(BC_IN, HW)
        feats = pl.pallas_call(
            _compress_kernel,
            out_shape=jax.ShapeDtypeStruct((B, C_OUT, 1), jnp.float32),
            in_specs=[_VMEM] * 3,
            out_specs=_VMEM,
        )(x2d, self._conv_mat, self._conv_b_col)
        return feats.reshape(B, C_OUT)

    def forward(self, x_nchw):
        return self._fused_jit(x_nchw)[0]

    def forward_with_features(self, x_nchw):
        # Single launch producing (logits, features) — avoids re-running the
        # conv when both forward() and compress() results are needed.
        return self._fused_jit(x_nchw)

    def compress(self, x_nchw):
        return self._compress_jit(x_nchw)


# ------------------------------ reference path ------------------------------

def _reference(x_nchw, p):
    x = jnp.transpose(x_nchw, (0, 2, 3, 1))
    xp = jnp.pad(x, ((0, 0), (1, 1), (1, 1), (0, 0)))
    y = jnp.zeros((B, H, W, C_OUT), jnp.float32)
    for dy in range(KH):
        for dx in range(KW):
            y = y + jnp.einsum("bhwc,co->bhwo",
                               xp[:, dy:dy + H, dx:dx + W, :],
                               p["conv_w"][dy, dx])
    y = jnp.maximum(y + p["conv_b"], 0.0)
    feats = jnp.mean(y, axis=(1, 2))
    logits = feats @ p["fc_w"] + p["fc_b"]
    return feats, logits


# ----------------------------------- main -----------------------------------

if __name__ == "__main__":
    key = jax.random.PRNGKey(0)
    k_x, k_cw, k_cb, k_fw, k_fb = jax.random.split(key, 5)

    params = {
        # conv weight stored directly in HWIO (KH, KW, C_IN, C_OUT)
        "conv_w": jax.random.normal(k_cw, (KH, KW, C_IN, C_OUT),
                                    jnp.float32) * 0.1,
        "conv_b": jax.random.normal(k_cb, (C_OUT,), jnp.float32) * 0.1,
        "fc_w": jax.random.normal(k_fw, (C_OUT, NUM_CLASSES),
                                  jnp.float32) * 0.1,
        "fc_b": jax.random.normal(k_fb, (NUM_CLASSES,), jnp.float32) * 0.1,
    }

    x = jax.random.normal(k_x, (B, C_IN, H, W), jnp.float32)  # NCHW input

    model = CompressionWrapper(params)

    logits = jax.block_until_ready(model.forward(x))
    feats = jax.block_until_ready(model.compress(x))
    logits2, feats2 = model.forward_with_features(x)
    jax.block_until_ready((logits2, feats2))

    ref_feats, ref_logits = _reference(x, params)
    assert logits.shape == (B, NUM_CLASSES)
    assert feats.shape == (B, C_OUT)
    assert jnp.allclose(logits, ref_logits, atol=1e-4, rtol=1e-4)
    assert jnp.allclose(feats, ref_feats, atol=1e-4, rtol=1e-4)
    assert jnp.allclose(logits2, ref_logits, atol=1e-4, rtol=1e-4)
    assert jnp.allclose(feats2, ref_feats, atol=1e-4, rtol=1e-4)

    print("KERNEL_OK")
</pallas_src>

<mosaic_0001>
module attributes {stable_mosaic.version = 11 : i64} {
  func.func @_forward_kernel(%arg0: memref<8x256xf32, #tpu.memory_space<vmem>>, %arg1: memref<16x72xf32, #tpu.memory_space<vmem>>, %arg2: memref<16x1xf32, #tpu.memory_space<vmem>>, %arg3: memref<8x128xf32, #tpu.memory_space<vmem>>, %arg4: memref<1x128xf32, #tpu.memory_space<vmem>>, %arg5: memref<2x128xf32, #tpu.memory_space<vmem>>, %arg6: memref<2x8x1xf32, #tpu.memory_space<vmem>>) attributes {dimension_semantics = [], scalar_prefetch = 0 : i64, scratch_operands = 0 : i64, tpu.core_type = #tpu.core_type<tc>} {
    %c0 = arith.constant 0 : index
    %c0_0 = arith.constant 0 : index
    %0 = vector.load %arg0[%c0, %c0_0] : memref<8x256xf32, #tpu.memory_space<vmem>>, vector<8x256xf32>
    %1 = tpu.iota {dimensions = array<i32: 1>} : vector<8x256xi32>
    %c15_i32 = arith.constant 15 : i32
    %2 = vector.broadcast %c15_i32 : i32 to vector<8x256xi32>
    %3 = arith.andi %1, %2 : vector<8x256xi32>
    %c17_i32 = arith.constant 17 : i32
    %4 = tpu.dynamic_rotate %0 by %c17_i32 dim 1 : vector<8x256xf32>, i32 -> vector<8x256xf32>
    %c16_i32 = arith.constant 16 : i32
    %5 = vector.broadcast %c16_i32 : i32 to vector<8x256xi32>
    %6 = arith.cmpi sge, %1, %5 : vector<8x256xi32>
    %c1_i32 = arith.constant 1 : i32
    %7 = vector.broadcast %c1_i32 : i32 to vector<8x256xi32>
    %8 = arith.cmpi sge, %3, %7 : vector<8x256xi32>
    %9 = arith.andi %6, %8 : vector<8x256xi1>
    %cst = arith.constant 0.000000e+00 : f32
    %10 = vector.broadcast %cst : f32 to vector<8x256xf32>
    %11 = arith.select %9, %4, %10 : vector<8x256xi1>, vector<8x256xf32>
    %c16_i32_1 = arith.constant 16 : i32
    %12 = tpu.dynamic_rotate %0 by %c16_i32_1 dim 1 : vector<8x256xf32>, i32 -> vector<8x256xf32>
    %c16_i32_2 = arith.constant 16 : i32
    %13 = vector.broadcast %c16_i32_2 : i32 to vector<8x256xi32>
    %14 = arith.cmpi sge, %1, %13 : vector<8x256xi32>
    %cst_3 = arith.constant 0.000000e+00 : f32
    %15 = vector.broadcast %cst_3 : f32 to vector<8x256xf32>
    %16 = arith.select %14, %12, %15 : vector<8x256xi1>, vector<8x256xf32>
    %c15_i32_4 = arith.constant 15 : i32
    %17 = tpu.dynamic_rotate %0 by %c15_i32_4 dim 1 : vector<8x256xf32>, i32 -> vector<8x256xf32>
    %c16_i32_5 = arith.constant 16 : i32
    %18 = vector.broadcast %c16_i32_5 : i32 to vector<8x256xi32>
    %19 = arith.cmpi sge, %1, %18 : vector<8x256xi32>
    %c15_i32_6 = arith.constant 15 : i32
    %20 = vector.broadcast %c15_i32_6 : i32 to vector<8x256xi32>
    %21 = arith.cmpi slt, %3, %20 : vector<8x256xi32>
    %22 = arith.andi %19, %21 : vector<8x256xi1>
    %cst_7 = arith.constant 0.000000e+00 : f32
    %23 = vector.broadcast %cst_7 : f32 to vector<8x256xf32>
    %24 = arith.select %22, %17, %23 : vector<8x256xi1>, vector<8x256xf32>
    %c1_i32_8 = arith.constant 1 : i32
    %25 = tpu.dynamic_rotate %0 by %c1_i32_8 dim 1 : vector<8x256xf32>, i32 -> vector<8x256xf32>
    %c1_i32_9 = arith.constant 1 : i32
    %26 = vector.broadcast %c1_i32_9 : i32 to vector<8x256xi32>
    %27 = arith.cmpi sge, %3, %26 : vector<8x256xi32>
    %cst_10 = arith.constant 0.000000e+00 : f32
    %28 = vector.broadcast %cst_10 : f32 to vector<8x256xf32>
    %29 = arith.select %27, %25, %28 : vector<8x256xi1>, vector<8x256xf32>
    %c255_i32 = arith.constant 255 : i32
    %30 = tpu.dynamic_rotate %0 by %c255_i32 dim 1 : vector<8x256xf32>, i32 -> vector<8x256xf32>
    %c15_i32_11 = arith.constant 15 : i32
    %31 = vector.broadcast %c15_i32_11 : i32 to vector<8x256xi32>
    %32 = arith.cmpi slt, %3, %31 : vector<8x256xi32>
    %cst_12 = arith.constant 0.000000e+00 : f32
    %33 = vector.broadcast %cst_12 : f32 to vector<8x256xf32>
    %34 = arith.select %32, %30, %33 : vector<8x256xi1>, vector<8x256xf32>
    %c241_i32 = arith.constant 241 : i32
    %35 = tpu.dynamic_rotate %0 by %c241_i32 dim 1 : vector<8x256xf32>, i32 -> vector<8x256xf32>
    %c240_i32 = arith.constant 240 : i32
    %36 = vector.broadcast %c240_i32 : i32 to vector<8x256xi32>
    %37 = arith.cmpi slt, %1, %36 : vector<8x256xi32>
    %c1_i32_13 = arith.constant 1 : i32
    %38 = vector.broadcast %c1_i32_13 : i32 to vector<8x256xi32>
    %39 = arith.cmpi sge, %3, %38 : vector<8x256xi32>
    %40 = arith.andi %37, %39 : vector<8x256xi1>
    %cst_14 = arith.constant 0.000000e+00 : f32
    %41 = vector.broadcast %cst_14 : f32 to vector<8x256xf32>
    %42 = arith.select %40, %35, %41 : vector<8x256xi1>, vector<8x256xf32>
    %c240_i32_15 = arith.constant 240 : i32
    %43 = tpu.dynamic_rotate %0 by %c240_i32_15 dim 1 : vector<8x256xf32>, i32 -> vector<8x256xf32>
    %c240_i32_16 = arith.constant 240 : i32
    %44 = vector.broadcast %c240_i32_16 : i32 to vector<8x256xi32>
    %45 = arith.cmpi slt, %1, %44 : vector<8x256xi32>
    %cst_17 = arith.constant 0.000000e+00 : f32
    %46 = vector.broadcast %cst_17 : f32 to vector<8x256xf32>
    %47 = arith.select %45, %43, %46 : vector<8x256xi1>, vector<8x256xf32>
    %c239_i32 = arith.constant 239 : i32
    %48 = tpu.dynamic_rotate %0 by %c239_i32 dim 1 : vector<8x256xf32>, i32 -> vector<8x256xf32>
    %c240_i32_18 = arith.constant 240 : i32
    %49 = vector.broadcast %c240_i32_18 : i32 to vector<8x256xi32>
    %50 = arith.cmpi slt, %1, %49 : vector<8x256xi32>
    %c15_i32_19 = arith.constant 15 : i32
    %51 = vector.broadcast %c15_i32_19 : i32 to vector<8x256xi32>
    %52 = arith.cmpi slt, %3, %51 : vector<8x256xi32>
    %53 = arith.andi %50, %52 : vector<8x256xi1>
    %cst_20 = arith.constant 0.000000e+00 : f32
    %54 = vector.broadcast %cst_20 : f32 to vector<8x256xf32>
    %55 = arith.select %53, %48, %54 : vector<8x256xi1>, vector<8x256xf32>
    %56 = tpu.concatenate %11, %16, %24, %29, %0, %34, %42, %47, %55 in 0 : vector<8x256xf32>, vector<8x256xf32>, vector<8x256xf32>, vector<8x256xf32>, vector<8x256xf32>, vector<8x256xf32>, vector<8x256xf32>, vector<8x256xf32>, vector<8x256xf32> -> vector<72x256xf32>
    %c0_21 = arith.constant 0 : index
    %c0_22 = arith.constant 0 : index
    %57 = vector.load %arg1[%c0_21, %c0_22] : memref<16x72xf32, #tpu.memory_space<vmem>>, vector<16x72xf32>
    %cst_23 = arith.constant dense<0.000000e+00> : vector<16x256xf32>
    %58 = tpu.matmul %57, %56, %cst_23 {dimension_numbers = #tpu.dot_dimension_numbers<[1], [0], [0], [1], [0, 0, 1, 1], [], []>} : vector<16x72xf32>, vector<72x256xf32>, vector<16x256xf32> -> vector<16x256xf32>
    %c0_24 = arith.constant 0 : index
    %c0_25 = arith.constant 0 : index
    %59 = vector.load %arg2[%c0_24, %c0_25] : memref<16x1xf32, #tpu.memory_space<vmem>>, vector<16x1xf32>
    %60 = vector.broadcast %59 : vector<16x1xf32> to vector<16x256xf32>
    %61 = arith.addf %58, %60 : vector<16x256xf32>
    %cst_26 = arith.constant 0.000000e+00 : f32
    %62 = vector.broadcast %cst_26 : f32 to vector<16x256xf32>
    %63 = arith.maximumf %61, %62 : vector<16x256xf32>
    %64 = vector.shape_cast %63 : vector<16x256xf32> to vector<2x8x256xf32>
    %cst_27 = arith.constant dense<0.000000e+00> : vector<2x8xf32>
    %65 = vector.multi_reduction <add>, %64, %cst_27 [2] : vector<2x8x256xf32> to vector<2x8xf32>
    %66 = vector.shape_cast %65 : vector<2x8xf32> to vector<2x8x1xf32>
    %cst_28 = arith.constant 3.906250e-03 : f32
    %67 = vector.broadcast %cst_28 : f32 to vector<2x8x1xf32>
    %68 = arith.mulf %66, %67 : vector<2x8x1xf32>
    %c0_29 = arith.constant 0 : index
    %c0_30 = arith.constant 0 : index
    %c0_31 = arith.constant 0 : index
    %69 = vector.load %arg6[%c0_29, %c0_30, %c0_31] : memref<2x8x1xf32, #tpu.memory_space<vmem>>, vector<2x8x1xf32>
    tpu.vector_store %arg6[%c0_29, %c0_30, %c0_31], %68 {strides = array<i32>} : memref<2x8x1xf32, #tpu.memory_space<vmem>>, vector<2x8x1xf32>,
    %c0_32 = arith.constant 0 : index
    %c0_33 = arith.constant 0 : index
    %70 = vector.load %arg3[%c0_32, %c0_33] : memref<8x128xf32, #tpu.memory_space<vmem>>, vector<8x128xf32>
    %71 = vector.shape_cast %70 : vector<8x128xf32> to vector<1x8x128xf32>
    %72 = vector.broadcast %68 : vector<2x8x1xf32> to vector<2x8x128xf32>
    %73 = vector.broadcast %71 : vector<1x8x128xf32> to vector<2x8x128xf32>
    %74 = arith.mulf %72, %73 : vector<2x8x128xf32>
    %cst_34 = arith.constant dense<0.000000e+00> : vector<2x128xf32>
    %75 = vector.multi_reduction <add>, %74, %cst_34 [1] : vector<2x8x128xf32> to vector<2x128xf32>
    %c0_35 = arith.constant 0 : index
    %c0_36 = arith.constant 0 : index
    %76 = vector.load %arg4[%c0_35, %c0_36] : memref<1x128xf32, #tpu.memory_space<vmem>>, vector<1x128xf32>
    %77 = vector.broadcast %76 : vector<1x128xf32> to vector<2x128xf32>
    %78 = arith.addf %75, %77 : vector<2x128xf32>
    %c0_37 = arith.constant 0 : index
    %c0_38 = arith.constant 0 : index
    %79 = vector.load %arg5[%c0_37, %c0_38] : memref<2x128xf32, #tpu.memory_space<vmem>>, vector<2x128xf32>
    tpu.vector_store %arg5[%c0_37, %c0_38], %78 {strides = array<i32>} : memref<2x128xf32, #tpu.memory_space<vmem>>, vector<2x128xf32>,
    return
  }
}

</mosaic_0001>

<bundles_post_ra>
// kernel: _fused_impl.1
= control target key start
LH: loop header
LB: loop body
LE: loop exit
PB: predicated region body
PF: predicated region fallthrough
CT: control target
= control target key end

     0   :  { %s507_s0 = inlined_call_operand.vmem [shape: f32[8,256], index: 0, kind: input, shape index: {}]   ;;  %s508_s1 = inlined_call_operand.vmem [shape: f32[16,72], index: 1, kind: input, shape index: {}]   ;;  %s509_s2 = inlined_call_operand.vmem [shape: f32[16,1], index: 2, kind: input, shape index: {}]   ;;  %s510_s3 = inlined_call_operand.vmem [shape: f32[8,128], index: 3, kind: input, shape index: {}]   ;;  %s511_s4 = inlined_call_operand.vmem [shape: f32[1,128], index: 4, kind: input, shape index: {}]   ;;  %s512_s5 = inlined_call_operand.hbm [shape: f32[2,128], index: 5, kind: output, shape index: {0}]   ;;  %s513_s6 = inlined_call_operand.vmem [shape: f32[2,8,1], index: 6, kind: output, shape index: {1}]  }
   0x1   :  { %v372_v0 = vld [vmem:[%s507_s0] sm:$0xff] }
   0x2   :  { %12 = vsyncpa [#allocation3], 0  ;;  %s324_s23 = smov 112   ;;  %s325_s24 = smov 111   ;;  %v380_v1 = vld [vmem:[%s507_s0 + $0x8] sm:$0xff]  ;;  %v25_v2 = vlaneseq  ;;  %v120_v25 = vld [vmem:[%s509_s2] sm:$0xff] }
   0x3   :  { %98 = vrot.lane.b32.xlu1 %v372_v0, %s324_s23  ;;  %107 = vrot.lane.b32.xlu0 %v372_v0, %s325_s24  ;;  %s326_s25 = smov 113   ;;  %s327_s28 = smov 127   ;;  %v121_v24 = vld [vmem:[%s509_s2 + $0x8] sm:$0xff]  ;;  %v332_v28 = vmov 0   ;;  %v118_v47 = vld [vmem:[%s508_s1] sm:$0xff] }
   0x4   :  { %85 = vrot.lane.b32.xlu2 %v372_v0, %s326_s25  ;;  %s328_s29 = smov 1   ;;  %s329_s30 = smov 15   ;;  %v395_v3 = vand.u32 127, %v25_v2  ;;  %294 = vset.pattern.permute.xlu1 %v332_v28  ;;  %v119_v46 = vld [vmem:[%s508_s1 + $0x8] sm:$0xff]  ;;  %v297_v19 = vld [vmem:[%s511_s4] ss:$0 sm:$0xff] }
   0x5   :  { %s330_s0 = smov 16   ;;  %s331_s7 = smov 17   ;;  %295 = vset.pattern.permute.xlu2 %v332_v28  ;;  %296 = vset.pattern.permute.xlu0 %v332_v28 }
   0x6   :  { %v27_v5 = vadd.s32 128, %v395_v3  ;;  %v28_v9 = vand.u32 15, %v395_v3  ;;  %vm111_vm2 = vcmp.lt.s32.totalorder %v395_v3, 111  ;;  %vm102_vm5 = vcmp.lt.s32.totalorder %v395_v3, 112  ;;  %s333_s21 = smov [#allocation2]  }
   0x7   :  { %vm89_vm7 = vcmp.lt.s32.totalorder %v395_v3, 113  ;;  %vm80_vm10 = vcmp.lt.s32.totalorder %v395_v3, 127  ;;  %vm71_vm11 = vcmp.lt.s32.totalorder %v395_v3, 1  ;;  %vm37_vm12 = vcmp.ge.s32.totalorder %v395_v3, 16  ;;  %s233_s22 = sshll.u32 %s333_s21, 4  ;;  %s234_s22 = int_to_ptr.vmem [resolvable:$true] %s233_s22 }
   0x8   :  { %v29_v8 = vand.u32 15, %v27_v5  ;;  %vm93_vm1 = vcmp.lt.s32.totalorder %v27_v5, 240  ;;  %vm404_vm3 = vcmp.lt.s32.totalorder %v28_v9, 15  ;;  %vm421_vm8 = vcmp.ge.s32.totalorder %v28_v9, 1 }
   0x9   :  { %vm58_vm13 = vcmp.lt.s32.totalorder %v395_v3, 15  ;;  %vm63_vm14 = vmand %vm37_vm12, %vm404_vm3  ;;  %vm49_vm15 = vcmp.lt.s32.totalorder %v395_v3, 16 }
   0xa   :  { %vm399_vm0 = vcmp.lt.s32.totalorder %v29_v8, 15  ;;  %vm412_vm6 = vcmp.ge.s32.totalorder %v29_v8, 1 }
   0xb   :  { %100 = vrot.lane.b32.xlu1 %v380_v1, %s324_s23  ;;  %109 = vrot.lane.b32.xlu0 %v380_v1, %s325_s24  ;;  %vm115_vm4 = vmand %vm93_vm1, %vm399_vm0  ;;  %s235_s24 = sshll.u32 %s512_s5, 4  ;;  %s236_s24 = int_to_ptr.hbm [resolvable:$true] %s235_s24 }
   0xc   :  { %87 = vrot.lane.b32.xlu2 %v380_v1, %s326_s25  ;;  %vm95_vm9 = vmand %vm93_vm1, %vm412_vm6 }
  0x13   :  { %78 = vrot.lane.b32.xlu1 %v380_v1, %s327_s28  ;;  %76 = vrot.lane.b32.xlu0 %v372_v0, %s327_s28 }
  0x14   :  { %67 = vrot.lane.b32.xlu2 %v372_v0, %s328_s29 }
  0x1b   :  { %54 = vrot.lane.b32.xlu1 %v372_v0, %s329_s30  ;;  %69 = vrot.lane.b32.xlu0 %v380_v1, %s328_s29 }
  0x1c   :  { %56 = vrot.lane.b32.xlu2 %v380_v1, %s329_s30 }
  0x23   :  { %47 = vrot.lane.b32.xlu1 %v380_v1, %s330_s0  ;;  %45 = vrot.lane.b32.xlu0 %v372_v0, %s330_s0 }
  0x24   :  { %30 = vrot.lane.b32.xlu2 %v372_v0, %s331_s7 }
  0x2b   :  { %32 = vrot.lane.b32.xlu0 %v380_v1, %s331_s7  ;;  %129 = vperm.xlu1 %294, %v121_v24  }
  0x2c   :  { %124 = vperm.xlu2 %295, %v120_v25  }
  0x5e   :  { %v86_v4 = vpop.permute.xlu2 %85 }
  0x66   :  { %v88_v10 = vpop.permute.xlu2 %87 }
  0x67   :  { %v90_v22 = vsel %vm89_vm7, %v86_v4, %v88_v10  ;;  %v91_v23 = vsel %vm89_vm7, %v88_v10, %v86_v4 }
  0x6e   :  { %v68_v21 = vpop.permute.xlu2 %67 }
  0x75   :  { %v99_v6 = vpop.permute.xlu1 %98  ;;  %v108_v7 = vpop.permute.xlu0 %107 }
  0x76   :  { %v57_v31 = vpop.permute.xlu2 %56 }
  0x7d   :  { %v101_v13 = vpop.permute.xlu1 %100  ;;  %v110_v14 = vpop.permute.xlu0 %109 }
  0x7e   :  { %v112_v15 = vsel %vm111_vm2, %v108_v7, %v110_v14  ;;  %v113_v16 = vsel %vm111_vm2, %v110_v14, %v108_v7  ;;  %v103_v18 = vsel %vm102_vm5, %v99_v6, %v101_v13  ;;  %v104_v20 = vsel %vm102_vm5, %v101_v13, %v99_v6  ;;  %v31_v42 = vpop.permute.xlu2 %30 }
  0x7f   :  { %248 = vmatpush.msk.msra.mxu0 %vm404_vm3, %v112_v15  ;;  %266 = vmatpush.msk.msra.mxu2 %vm404_vm3, %v112_v15  ;;  %vm132_vm2 = vcmask 588800  }
  0x80   :  { %257 = vmatpush.msk.msra.mxu1 %vm115_vm4, %v113_v16  ;;  %275 = vmatpush.msk.msra.mxu3 %vm115_vm4, %v113_v16  ;;  %vm224_vm4 = vcmask 1041409  }
  0x81   :  { %147 = vmatpush.msra.mxu0 %v103_v18  ;;  %267 = vmatpush.msra.mxu2 %v103_v18 }
  0x82   :  { %258 = vmatpush.msk.msra.mxu1 %vm93_vm1, %v104_v20  ;;  %276 = vmatpush.msk.msra.mxu3 %vm93_vm1, %v104_v20  ;;  %vm34_vm1 = vcmp.lt.s32.totalorder %v395_v3, 17 }
  0x83   :  { %249 = vmatpush.msk.msra.mxu0 %vm421_vm8, %v90_v22  ;;  %268 = vmatpush.msk.msra.mxu2 %vm421_vm8, %v90_v22 }
  0x84   :  { %259 = vmatpush.msk.msra.mxu1 %vm95_vm9, %v91_v23  ;;  %277 = vmatpush.msk.msra.mxu3 %vm95_vm9, %v91_v23 }
  0x85   :  { %v79_v26 = vpop.permute.xlu1 %78  ;;  %v77_v27 = vpop.permute.xlu0 %76 }
  0x86   :  { %v81_v29 = vsel %vm80_vm10, %v77_v27, %v79_v26  ;;  %v82_v30 = vsel %vm80_vm10, %v79_v26, %v77_v27  ;;  %v125_v48 = vpop.permute.xlu2 %124 }
  0x87   :  { %250 = vmatpush.msk.msra.mxu0 %vm404_vm3, %v81_v29  ;;  %269 = vmatpush.msk.msra.mxu2 %vm404_vm3, %v81_v29  ;;  %vm197_vm3 = vcmask 7168  }
  0x88   :  { %260 = vmatpush.msk.msra.mxu1 %vm399_vm0, %v82_v30  ;;  %278 = vmatpush.msk.msra.mxu3 %vm399_vm0, %v82_v30 }
  0x89   :  { %150 = vmatpush.msra.mxu0 %v372_v0  ;;  %270 = vmatpush.msra.mxu2 %v372_v0  ;;  %v200_v0 = vld [vmem:[%s510_s3] sm:$0xff] }
  0x8a   :  { %173 = vmatpush.msra.mxu1 %v380_v1  ;;  %279 = vmatpush.msra.mxu3 %v380_v1 }
  0x8d   :  { %v55_v32 = vpop.permute.xlu1 %54  ;;  %v70_v33 = vpop.permute.xlu0 %69 }
  0x8e   :  { %v73_v34 = vsel %vm71_vm11, %v70_v33, %v68_v21  ;;  %v72_v35 = vsel %vm71_vm11, %v68_v21, %v70_v33  ;;  %v60_v36 = vsel %vm58_vm13, %v57_v31, %v55_v32  ;;  %v59_v37 = vsel %vm58_vm13, %v55_v32, %v57_v31 }
  0x8f   :  { %251 = vmatpush.msk.msra.mxu0 %vm421_vm8, %v73_v34  ;;  %271 = vmatpush.msk.msra.mxu2 %vm421_vm8, %v73_v34 }
  0x90   :  { %261 = vmatpush.msk.msra.mxu1 %vm412_vm6, %v72_v35  ;;  %280 = vmatpush.msk.msra.mxu3 %vm412_vm6, %v72_v35 }
  0x91   :  { %252 = vmatpush.msk.msra.mxu0 %vm63_vm14, %v60_v36  ;;  %272 = vmatpush.msk.msra.mxu2 %vm63_vm14, %v60_v36 }
  0x92   :  { %262 = vmatpush.msk.msra.mxu1 %vm399_vm0, %v59_v37  ;;  %281 = vmatpush.msk.msra.mxu3 %vm399_vm0, %v59_v37  ;;  %vm41_vm0 = vmand %vm37_vm12, %vm421_vm8 }
  0x95   :  { %v48_v38 = vpop.permute.xlu1 %47  ;;  %v46_v39 = vpop.permute.xlu0 %45 }
  0x96   :  { %v51_v40 = vsel %vm49_vm15, %v48_v38, %v46_v39  ;;  %v50_v41 = vsel %vm49_vm15, %v46_v39, %v48_v38 }
  0x97   :  { %253 = vmatpush.msk.msra.mxu0 %vm37_vm12, %v51_v40  ;;  %273 = vmatpush.msk.msra.mxu2 %vm37_vm12, %v51_v40 }
  0x98   :  { %176 = vmatpush.msra.mxu1 %v50_v41  ;;  %282 = vmatpush.msra.mxu3 %v50_v41 }
  0x9d   :  { %v33_v43 = vpop.permute.xlu0 %32  ;;  %v130_v55 = vpop.permute.xlu1 %129 }
  0x9e   :  { %v36_v44 = vsel %vm34_vm1, %v33_v43, %v31_v42  ;;  %v35_v45 = vsel %vm34_vm1, %v31_v42, %v33_v43 }
  0x9f   :  { %254 = vmatpush.msk.msra.mxu0 %vm41_vm0, %v36_v44  ;;  %274 = vmatpush.msk.msra.mxu2 %vm41_vm0, %v36_v44 }
  0xa0   :  { %263 = vmatpush.msk.msra.mxu1 %vm412_vm6, %v35_v45  ;;  %283 = vmatpush.msk.msra.mxu3 %vm412_vm6, %v35_v45 }
  0xa1   :  { %256 = vmatmul.msk.f32.vlgmr.msra.gmra.mxu2 %vm132_vm2, %v119_v46  ;;  %265 = vmatmul.msk.f32.vlgmr.msra.gmra.mxu3 %vm132_vm2, %v119_v46 }
  0xa2   :  { %255 = vmatmul.msk.f32.vlgmr.msra.gmra.mxu0 %vm132_vm2, %v118_v47  ;;  %264 = vmatmul.msk.f32.vlgmr.msra.gmra.mxu1 %vm132_vm2, %v118_v47 }
 0x11f   :  { %v156_v49 = vpop.f32.mrf.mxu0  ;;  %v179_v50 = vpop.f32.mrf.mxu1 }
 0x120   :  { %v157_v51 = vadd.f32 %v156_v49, %v125_v48  ;;  %v180_v52 = vadd.f32 %v179_v50, %v125_v48 }
 0x122   :  { %v185_v53 = vmax.f32 %v157_v51, 0.0  ;;  %v186_v54 = vmax.f32 %v180_v52, 0.0 }
 0x124   :  { %v159_v56 = vpop.f32.mrf.mxu2  ;;  %v182_v57 = vpop.f32.mrf.mxu3  ;;  %v189_v58 = vadd.f32 %v186_v54, %v185_v53 }
 0x125   :  { %v160_v59 = vadd.f32 %v159_v56, %v130_v55  ;;  %v183_v60 = vadd.f32 %v182_v57, %v130_v55 }
 0x126   :  { %190 = vadd.xlane.f32.xlu1 %v189_v58 }
 0x127   :  { %v187_v61 = vmax.f32 %v160_v59, 0.0  ;;  %v188_v62 = vmax.f32 %v183_v60, 0.0 }
 0x129   :  { %v192_v63 = vadd.f32 %v188_v62, %v187_v61 }
 0x12b   :  { %193 = vadd.xlane.f32.xlu0 %v192_v63 }
 0x199   :  { %v191_v1 = vpop.xlane.xlu1 %190 }
 0x19a   :  { %v195_v2 = vmul.f32 0.00390625, %v191_v1 }
 0x19c   :  { %198 = vst.msk [vmem:[%s513_s6] sm:$0xff] %vm197_vm3, %v195_v2  ;;  %v201_v3 = vmul.f32 %v200_v0, %v195_v2 }
 0x19e   :  { %v203_v4 = vrot.slane %v201_v3, 4  ;;  %v194_v5 = vpop.xlane.xlu0 %193 }
 0x19f   :  { %v196_v6 = vmul.f32 0.00390625, %v194_v5 }
 0x1a0   :  { %v204_v7 = vadd.f32 %v203_v4, %v201_v3 }
 0x1a1   :  { %199 = vst.msk [vmem:[%s513_s6 + $0x8] sm:$0xff] %vm197_vm3, %v196_v6  ;;  %v202_v8 = vmul.f32 %v200_v0, %v196_v6 }
 0x1a2   :  { %v205_v9 = vrot.slane %v204_v7, 2 }
 0x1a3   :  { %v209_v10 = vrot.slane %v202_v8, 4 }
 0x1a4   :  { %v206_v11 = vadd.f32 %v205_v9, %v204_v7 }
 0x1a5   :  { %v210_v12 = vadd.f32 %v209_v10, %v202_v8 }
 0x1a6   :  { %v207_v14 = vrot.slane %v206_v11, 1 }
 0x1a7   :  { %v211_v13 = vrot.slane %v210_v12, 2 }
 0x1a8   :  { %v208_v17 = vadd.f32 %v207_v14, %v206_v11 }
 0x1a9   :  { %v212_v15 = vadd.f32 %v211_v13, %v210_v12 }
 0x1aa   :  { %v219_v21 = vadd.f32 %v297_v19, %v208_v17 }
 0x1ab   :  { %v213_v16 = vrot.slane %v212_v15, 1 }
 0x1ad   :  { %v214_v18 = vadd.f32 %v213_v16, %v212_v15 }
 0x1af   :  { %v220_v20 = vadd.f32 %v297_v19, %v214_v18 }
 0x1b1   :  { %v223_v22 = vrot.slane %v220_v20, 7 }
 0x1b3   :  { %v225_v23 = vsel %vm224_vm4, %v223_v22, %v219_v21 }
 0x1b4   :  { %227 = vst [vmem:[#allocation2] sm:$0x3] %v225_v23 }
 0x1b5   :  { %238 = dma.vmem_to_hbm [thread:$0]  %s234_s22, 32, %s236_s24, [#allocation3]  }
 0x1b6   :  { %322 = dma.done.wait [#allocation3], 32  }
 0x1b7   :  { %323 = vsyncadd [#allocation3], 4294967264 }
 0x1b8   :  { %247 = vsyncpa [#allocation3], 1 }

</bundles_post_ra>
